<compile_context>
chip_gen: v5e
topology: v5e:2x2
jax: 0.10.0
libtpu: 0.0.40
codegen_flags: <defaults>
</compile_context>

<pallas_src>
import jax
import jax.numpy as jnp
from jax import lax
from jax.experimental import pallas as pl
from jax.experimental.pallas import tpu as pltpu


# ---------------------------------------------------------------------------
# Hardware-aware helpers
# ---------------------------------------------------------------------------

def _vmem_capacity_bytes():
    """Physical per-core VMEM (128 MiB v5e/v6e, 64 MiB v7x); conservative fallback."""
    try:
        info = pltpu.get_tpu_info()
        cap = int(getattr(info, "vmem_capacity_bytes", 0) or 0)
        if cap > 0:
            return cap
    except Exception:
        pass
    return 64 << 20


def _vmem_limit_bytes(need_bytes):
    """Explicit scoped-VMEM limit: >= our estimated need (+headroom), >= the
    v5e/v6e defaults, and never more than 3/4 of physical VMEM (v7x cap)."""
    cap = _vmem_capacity_bytes()
    limit = max(int(need_bytes) + (4 << 20), 32 << 20)
    return int(min(limit, (cap * 3) // 4))


def _pick_rows(h, bytes_per_row, requested=None, budget=None, force_split=False):
    """Largest row strip dividing `h` within a per-step VMEM budget.
    `force_split` guarantees >= 2 strips so both v7x TensorCores get work when
    the batch axis has a single program."""
    if requested is not None:
        if h % requested != 0:
            raise ValueError(f"row_block={requested} must divide {h}")
        return requested
    if budget is None:
        budget = _vmem_capacity_bytes() // 8       # 16 MiB v5e/v6e, 8 MiB v7x
    cands = [c for c in (8, 16, 32, 64, 128, 256, 512) if c < h and h % c == 0]
    cands.append(h)
    fitting = [c for c in cands if (c + 2) * bytes_per_row <= budget]
    rs = max(fitting) if fitting else min(cands)
    if force_split and rs == h and h % 2 == 0:
        rs = h // 2
    return rs


# ---------------------------------------------------------------------------
# Upsample: ConvTranspose2d(kernel=2, stride=2) as one fused matmul per strip
# ---------------------------------------------------------------------------

def _make_upsample_kernel(rs, W, Cin, Ch):
    def kernel(x_ref, w_ref, b_ref, o_ref):
        # x_ref: (1, rs, W, Cin)      rows of x1
        # w_ref: (Cin, 4*Ch)          columns ordered (a, b, oc)
        # b_ref: (1, 4*Ch)  f32       bias tiled over the (a, b) sub-pixels
        # o_ref: (1, rs, 2, W, 2*Ch)  [i, a, j, b*Ch+c] == up(x1)[2i+a, 2j+b, c]
        x = x_ref[0].reshape(rs * W, Cin)                 # leading-dim merge (free)
        # one fused MXU matmul for both row sub-pixels (half the matmul pushes)
        y = jnp.dot(x, w_ref[...], preferred_element_type=jnp.float32)
        y = y + b_ref[...]
        for a in range(2):
            ya = y[:, a * 2 * Ch:(a + 1) * 2 * Ch]        # static lane slice
            o_ref[0, :, a, :, :] = ya.reshape(rs, W, 2 * Ch).astype(o_ref.dtype)
    return kernel


def conv_transpose_2x2_s2(x_nhwc, w, b, *, compute_dtype=jnp.bfloat16,
                          out_dtype=jnp.bfloat16, row_block=None):
    """ConvTranspose2d(k=2, s=2).

    x_nhwc: (N, H, W, Cin); w: (Cin, Ch, 2, 2) (PyTorch layout); b: (Ch,).
    Returns (N, 2H, 2W, Ch).  The kernel's output layout makes the final
    reshape a pure (free) reshape — no HBM pixel-shuffle transpose.
    """
    N, H, W, Cin = x_nhwc.shape
    Ch = w.shape[1]
    itemsize = jnp.dtype(compute_dtype).itemsize
    row_bytes = W * (Cin + 4 * Ch) * itemsize * 2
    rs = _pick_rows(H, row_bytes, requested=row_block, force_split=(N == 1))
    n_strips = H // rs

    # out[n, 2i+a, 2j+b, oc] = b[oc] + sum_c x[n,i,j,c] * w[c, oc, a, b]
    w_mat = jnp.transpose(w, (0, 2, 3, 1)).reshape(Cin, 4 * Ch)   # cols (a,b,oc)
    b4 = jnp.tile(b, 4).reshape(1, 4 * Ch)                        # cols (a,b,oc)

    flops = 2 * N * H * W * Cin * 4 * Ch
    bytes_accessed = int((N * H * W * Cin + 4 * N * H * W * Ch
                          + Cin * 4 * Ch) * itemsize)
    need = (2 * (rs * W * Cin + rs * 2 * W * 2 * Ch) + Cin * 4 * Ch) * itemsize \
        + (1 << 20)

    out = pl.pallas_call(
        _make_upsample_kernel(rs, W, Cin, Ch),
        out_shape=jax.ShapeDtypeStruct((N, H, 2, W, 2 * Ch), out_dtype),
        grid=(N, n_strips),
        in_specs=[
            pl.BlockSpec((1, rs, W, Cin), lambda n, s: (n, s, 0, 0)),
            pl.BlockSpec((Cin, 4 * Ch), lambda n, s: (0, 0)),
            pl.BlockSpec((1, 4 * Ch), lambda n, s: (0, 0)),
        ],
        out_specs=pl.BlockSpec((1, rs, 2, W, 2 * Ch),
                               lambda n, s: (n, s, 0, 0, 0)),
        compiler_params=pltpu.CompilerParams(
            dimension_semantics=("parallel", "parallel"),
            vmem_limit_bytes=_vmem_limit_bytes(need)),
        cost_estimate=pl.CostEstimate(flops=flops, transcendentals=0,
                                      bytes_accessed=bytes_accessed),
    )(x_nhwc.astype(compute_dtype), w_mat.astype(compute_dtype),
      b4.astype(jnp.float32))

    return out.reshape(N, 2 * H, 2 * W, Ch)   # pure reshape, no data movement


# ---------------------------------------------------------------------------
# Fused (multi-input) 3x3 conv, padding=1, bias + LeakyReLU(0.2)
# ---------------------------------------------------------------------------

def _make_conv3x3_kernel(n_in, rs, n_strips, W2, cins, Cout):
    Wp = W2 + 2

    def kernel(*refs):
        bulk = refs[0:n_in]                  # (1, rs, W2, cin)   pipelined rows
        top = refs[n_in:2 * n_in]            # (1, 1, W2, cin)    pipelined halo
        bot = refs[2 * n_in:3 * n_in]        # (1, 1, W2, cin)    pipelined halo
        wr = refs[3 * n_in:4 * n_in]         # (3, 3, cin, Cout)
        b_ref = refs[4 * n_in]               # (1, Cout) f32
        o_ref = refs[4 * n_in + 1]           # (1, rs, W2, Cout)
        xs = refs[4 * n_in + 2:]             # (rs+2, W2+2, cin)  padded scratch

        s = pl.program_id(1)

        # 1) Assemble the zero-padded (rs+2, W2+2, cin) window per input.  All
        #    rows (bulk + both halos) arrive through the automatic pipeline,
        #    prefetched one grid step ahead -> no manual DMAs, no semaphores,
        #    no exposed in-step DMA latency.  Image borders are zero padded.
        for i in range(n_in):
            cin = cins[i]
            dt = xs[i].dtype
            zcol = jnp.zeros((rs + 2, cin), dt)
            xs[i][:, 0, :] = zcol                            # left pad column
            xs[i][:, Wp - 1, :] = zcol                       # right pad column
            xs[i][1:rs + 1, 1:W2 + 1, :] = bulk[i][0]        # bulk rows

            @pl.when(s == 0)
            def _(i=i, cin=cin, dt=dt):
                xs[i][0, 1:W2 + 1, :] = jnp.zeros((W2, cin), dt)

            @pl.when(s > 0)
            def _(i=i):
                xs[i][0, 1:W2 + 1, :] = top[i][0, 0]

            @pl.when(s == n_strips - 1)
            def _(i=i, cin=cin, dt=dt):
                xs[i][rs + 1, 1:W2 + 1, :] = jnp.zeros((W2, cin), dt)

            @pl.when(s < n_strips - 1)
            def _(i=i):
                xs[i][rs + 1, 1:W2 + 1, :] = bot[i][0, 0]

        # 2) 9 windowed *ref* loads per input (no value-slice relayouts), each
        #    feeding a 2-D MXU matmul accumulated in f32.  The
        #    (rs, W2, cin) -> (rs*W2, cin) reshape is a leading-dim merge
        #    (layout preserving for W2 % 8 == 0).  Summing over the inputs
        #    implements the conv over the (virtually) concatenated channels of
        #    torch.cat([x2, up(x1)]).
        acc = jnp.zeros((rs * W2, Cout), jnp.float32)
        for i in range(n_in):
            cin = cins[i]
            w = wr[i][...]
            for dy in range(3):
                for dx in range(3):
                    patch = xs[i][dy:dy + rs, dx:dx + W2, :]
                    acc = acc + jnp.dot(patch.reshape(rs * W2, cin), w[dy, dx],
                                        preferred_element_type=jnp.float32)

        acc = acc + b_ref[...]
        acc = jnp.where(acc > 0, acc, 0.2 * acc)             # LeakyReLU(0.2)
        o_ref[...] = acc.reshape(1, rs, W2, Cout).astype(o_ref.dtype)

    return kernel


def conv3x3_lrelu(inputs, weights, bias, *, out_dtype=jnp.float32,
                  compute_dtype=jnp.bfloat16, row_block=None):
    """3x3 conv (padding=1) + bias + LeakyReLU(0.2), fused over several inputs.

    `inputs` is a list of NHWC arrays treated as one tensor whose channels are
    the concatenation of the entries; `weights[i]` is the matching HWIO slice
    (3, 3, cin_i, Cout).  Passing the pieces separately fuses the torch.cat
    into the conv (no HBM concatenate).
    """
    n_in = len(inputs)
    N, H_out, W2, _ = inputs[0].shape
    cins = [int(x.shape[-1]) for x in inputs]
    Cout = int(weights[0].shape[-1])
    itemsize = jnp.dtype(compute_dtype).itemsize

    row_bytes = W2 * (2 * sum(cins) + Cout) * itemsize * 2
    rs = _pick_rows(H_out, row_bytes, requested=row_block, force_split=(N == 1))
    n_strips = H_out // rs

    inputs = [x.astype(compute_dtype) for x in inputs]
    weights = [w.astype(compute_dtype) for w in weights]
    b2 = bias.reshape(1, Cout).astype(jnp.float32)

    kernel = _make_conv3x3_kernel(n_in, rs, n_strips, W2, cins, Cout)

    bulk_map = lambda n, s: (n, s, 0, 0)
    # Halo rows as clamped-index 1-row blocks; clamped (border) rows are
    # overwritten with zeros inside the kernel.
    top_map = lambda n, s: (n, jnp.maximum(s * rs - 1, 0), 0, 0)
    bot_map = lambda n, s: (n, jnp.minimum((s + 1) * rs, H_out - 1), 0, 0)

    in_specs = (
        [pl.BlockSpec((1, rs, W2, c), bulk_map) for c in cins]
        + [pl.BlockSpec((1, 1, W2, c), top_map) for c in cins]
        + [pl.BlockSpec((1, 1, W2, c), bot_map) for c in cins]
        + [pl.BlockSpec((3, 3, c, Cout), lambda n, s: (0, 0, 0, 0)) for c in cins]
        + [pl.BlockSpec((1, Cout), lambda n, s: (0, 0))]
    )
    scratch_shapes = [pltpu.VMEM((rs + 2, W2 + 2, c), compute_dtype) for c in cins]

    flops = 2 * 9 * N * H_out * W2 * sum(cins) * Cout
    bytes_accessed = int(sum(x.size for x in inputs) * itemsize
                         + sum(w.size for w in weights) * itemsize
                         + N * H_out * W2 * Cout * jnp.dtype(out_dtype).itemsize)

    blk_bytes = sum(rs * W2 * c for c in cins) * itemsize
    halo_bytes = sum(2 * W2 * c for c in cins) * itemsize
    out_blk_bytes = rs * W2 * Cout * jnp.dtype(out_dtype).itemsize
    scratch_bytes = sum((rs + 2) * (W2 + 2) * c for c in cins) * itemsize
    w_bytes = sum(w.size for w in weights) * itemsize
    need = 2 * (blk_bytes + halo_bytes + out_blk_bytes) + scratch_bytes + w_bytes

    return pl.pallas_call(
        kernel,
        out_shape=jax.ShapeDtypeStruct((N, H_out, W2, Cout), out_dtype),
        grid=(N, n_strips),
        in_specs=in_specs,
        out_specs=pl.BlockSpec((1, rs, W2, Cout), lambda n, s: (n, s, 0, 0)),
        scratch_shapes=scratch_shapes,
        compiler_params=pltpu.CompilerParams(
            dimension_semantics=("parallel", "parallel"),
            vmem_limit_bytes=_vmem_limit_bytes(need)),
        cost_estimate=pl.CostEstimate(flops=flops, transcendentals=0,
                                      bytes_accessed=bytes_accessed),
    )(*inputs, *inputs, *inputs, *weights, b2)


# ---------------------------------------------------------------------------
# Module wrapper (NCHW in / NCHW out, like the PyTorch `Up`)
# ---------------------------------------------------------------------------

class UpPallas:
    """JAX/Pallas port of the PyTorch `Up` module."""

    def __init__(self, in_ch, out_ch, key, *, compute_dtype=jnp.bfloat16,
                 row_block=None):
        half = in_ch // 2
        self.half = half
        self.compute_dtype = compute_dtype
        self.row_block = row_block
        ks = jax.random.split(key, 6)

        def u(k, shape, fan_in):
            bound = 1.0 / jnp.sqrt(float(fan_in))
            return jax.random.uniform(k, shape, jnp.float32, -bound, bound)

        # ConvTranspose2d(in_ch, half, 2, stride=2): weight (in_ch, half, 2, 2).
        self.w_up = u(ks[0], (in_ch, half, 2, 2), half * 4)
        self.b_up = u(ks[1], (half,), half * 4)
        # DoubleConv weights, stored HWIO for the NHWC kernels.
        self.w1 = u(ks[2], (3, 3, in_ch, out_ch), in_ch * 9)
        self.b1 = u(ks[3], (out_ch,), in_ch * 9)
        self.w2 = u(ks[4], (3, 3, out_ch, out_ch), out_ch * 9)
        self.b2 = u(ks[5], (out_ch,), out_ch * 9)

    def __call__(self, x1_nchw, x2_nchw):
        cdt = self.compute_dtype
        half = self.half

        # NCHW -> NHWC at the module boundary (cast fuses into the transpose).
        x1 = jnp.transpose(x1_nchw, (0, 2, 3, 1))
        x2 = jnp.transpose(x2_nchw, (0, 2, 3, 1)).astype(cdt)

        # Upsample (no HBM pixel-shuffle transpose; output already NHWC-major).
        x1_up = conv_transpose_2x2_s2(x1, self.w_up, self.b_up,
                                      compute_dtype=cdt, out_dtype=cdt)

        # torch.cat([x2, x1_up], dim=1) fused into the first conv by splitting
        # w1 along its input-channel axis -> no HBM concatenate.
        y = conv3x3_lrelu([x2, x1_up],
                          [self.w1[:, :, :half, :], self.w1[:, :, half:, :]],
                          self.b1, out_dtype=cdt, compute_dtype=cdt,
                          row_block=self.row_block)
        y = conv3x3_lrelu([y], [self.w2], self.b2,
                          out_dtype=jnp.float32, compute_dtype=cdt,
                          row_block=self.row_block)

        # NHWC -> NCHW
        return jnp.transpose(y, (0, 3, 1, 2))


# ---------------------------------------------------------------------------
# Pure-JAX f32 reference (for a tolerance check of the bf16 kernels)
# ---------------------------------------------------------------------------

def _reference(mod, x1_nchw, x2_nchw):
    x1 = jnp.transpose(x1_nchw, (0, 2, 3, 1)).astype(jnp.float32)
    x2 = jnp.transpose(x2_nchw, (0, 2, 3, 1)).astype(jnp.float32)
    N, H, W, _ = x1.shape
    Ch = mod.w_up.shape[1]
    # ConvTranspose2d(k=2,s=2): out[n,2i+a,2j+b,o] = b[o] + sum_c x[n,i,j,c] w[c,o,a,b]
    t = jnp.einsum('nijc,coab->niajbo', x1, mod.w_up) + mod.b_up
    up = t.reshape(N, 2 * H, 2 * W, Ch)
    x = jnp.concatenate([x2, up], axis=-1)

    def conv(z, w, b):
        y = lax.conv_general_dilated(z, w, (1, 1), 'SAME',
                                     dimension_numbers=('NHWC', 'HWIO', 'NHWC'))
        y = y + b
        return jnp.where(y > 0, y, 0.2 * y)

    y = conv(x, mod.w1, mod.b1)
    y = conv(y, mod.w2, mod.b2)
    return jnp.transpose(y, (0, 3, 1, 2))


if __name__ == "__main__":
    in_ch, out_ch = 8, 4
    N, H, W = 2, 8, 8                 # x1 spatial; x2 is the 2H x 2W skip tensor

    key = jax.random.PRNGKey(0)
    k_mod, k1, k2 = jax.random.split(key, 3)

    x1 = jax.random.normal(k1, (N, in_ch, H, W), jnp.float32)             # NCHW
    x2 = jax.random.normal(k2, (N, in_ch // 2, 2 * H, 2 * W), jnp.float32)

    # row_block=8 -> two row strips per image so the pipelined-halo path runs.
    up = UpPallas(in_ch, out_ch, k_mod, row_block=8)
    out = jax.block_until_ready(up(x1, x2))

    assert out.shape == (N, out_ch, 2 * H, 2 * W), out.shape
    assert out.dtype == jnp.float32
    assert bool(jnp.all(jnp.isfinite(out)))

    # bf16 compute vs f32 reference -> tolerance, not exact match.
    ref = _reference(up, x1, x2)
    err = float(jnp.max(jnp.abs(out - ref)))
    assert err < 0.1, f"max abs error vs reference: {err}"
    print("KERNEL_OK")
</pallas_src>

<mosaic_0001>
module attributes {stable_mosaic.version = 11 : i64} {
  func.func @kernel(%arg0: i32, %arg1: i32, %arg2: memref<1x8x8x8xbf16, #tpu.memory_space<vmem>>, %arg3: memref<8x16xbf16, #tpu.memory_space<vmem>>, %arg4: memref<1x16xf32, #tpu.memory_space<vmem>>, %arg5: memref<1x8x2x8x8xbf16, #tpu.memory_space<vmem>>) attributes {dimension_semantics = [#tpu.dimension_semantics<parallel>, #tpu.dimension_semantics<parallel>], iteration_bounds = array<i64: 2, 1>, scalar_prefetch = 0 : i64, scratch_operands = 0 : i64, tpu.core_type = #tpu.core_type<tc>, window_params = [{transform_indices = @transform_0, window_bounds = array<i64: 1, 8, 8, 8>}, {pipeline_mode = #tpu.pipeline_mode<synchronous>, transform_indices = @transform_1, window_bounds = array<i64: 8, 16>}, {pipeline_mode = #tpu.pipeline_mode<synchronous>, transform_indices = @transform_2, window_bounds = array<i64: 1, 16>}, {transform_indices = @transform_3, window_bounds = array<i64: 1, 8, 2, 8, 8>}]} {
    %c0 = arith.constant 0 : index
    %c0_0 = arith.constant 0 : index
    %c0_1 = arith.constant 0 : index
    %c0_2 = arith.constant 0 : index
    %0 = vector.load %arg2[%c0, %c0_0, %c0_1, %c0_2] : memref<1x8x8x8xbf16, #tpu.memory_space<vmem>>, vector<1x8x8x8xbf16>
    %1 = vector.shape_cast %0 : vector<1x8x8x8xbf16> to vector<8x8x8xbf16>
    %2 = vector.shape_cast %1 : vector<8x8x8xbf16> to vector<64x8xbf16>
    %c0_3 = arith.constant 0 : index
    %c0_4 = arith.constant 0 : index
    %3 = vector.load %arg3[%c0_3, %c0_4] : memref<8x16xbf16, #tpu.memory_space<vmem>>, vector<8x16xbf16>
    %cst = arith.constant dense<0.000000e+00> : vector<64x16xf32>
    %4 = tpu.matmul %2, %3, %cst {dimension_numbers = #tpu.dot_dimension_numbers<[1], [0], [0], [1], [0, 0, 1, 1], [], []>} : vector<64x8xbf16>, vector<8x16xbf16>, vector<64x16xf32> -> vector<64x16xf32>
    %c0_5 = arith.constant 0 : index
    %c0_6 = arith.constant 0 : index
    %5 = vector.load %arg4[%c0_5, %c0_6] : memref<1x16xf32, #tpu.memory_space<vmem>>, vector<1x16xf32>
    %6 = vector.broadcast %5 : vector<1x16xf32> to vector<64x16xf32>
    %7 = arith.addf %4, %6 : vector<64x16xf32>
    %8 = vector.extract_strided_slice %7 {offsets = [0, 0], sizes = [64, 8], strides = [1, 1]} : vector<64x16xf32> to vector<64x8xf32>
    %9 = vector.shape_cast %8 : vector<64x8xf32> to vector<8x8x8xf32>
    %10 = arith.truncf %9 : vector<8x8x8xf32> to vector<8x8x8xbf16>
    %c0_7 = arith.constant 0 : index
    %c0_8 = arith.constant 0 : index
    %c0_9 = arith.constant 0 : index
    %c0_10 = arith.constant 0 : index
    %c0_11 = arith.constant 0 : index
    %11 = vector.load %arg5[%c0_7, %c0_8, %c0_9, %c0_10, %c0_11] : memref<1x8x2x8x8xbf16, #tpu.memory_space<vmem>>, vector<1x8x1x8x8xbf16>
    %12 = vector.shape_cast %11 : vector<1x8x1x8x8xbf16> to vector<8x8x8xbf16>
    %13 = vector.shape_cast %10 : vector<8x8x8xbf16> to vector<1x8x1x8x8xbf16>
    tpu.vector_store %arg5[%c0_7, %c0_8, %c0_9, %c0_10, %c0_11], %13 {strides = array<i32>} : memref<1x8x2x8x8xbf16, #tpu.memory_space<vmem>>, vector<1x8x1x8x8xbf16>,
    %14 = vector.extract_strided_slice %7 {offsets = [0, 8], sizes = [64, 8], strides = [1, 1]} : vector<64x16xf32> to vector<64x8xf32>
    %15 = vector.shape_cast %14 : vector<64x8xf32> to vector<8x8x8xf32>
    %16 = arith.truncf %15 : vector<8x8x8xf32> to vector<8x8x8xbf16>
    %c0_12 = arith.constant 0 : index
    %c0_13 = arith.constant 0 : index
    %c1 = arith.constant 1 : index
    %c0_14 = arith.constant 0 : index
    %c0_15 = arith.constant 0 : index
    %17 = vector.load %arg5[%c0_12, %c0_13, %c1, %c0_14, %c0_15] : memref<1x8x2x8x8xbf16, #tpu.memory_space<vmem>>, vector<1x8x1x8x8xbf16>
    %18 = vector.shape_cast %17 : vector<1x8x1x8x8xbf16> to vector<8x8x8xbf16>
    %19 = vector.shape_cast %16 : vector<8x8x8xbf16> to vector<1x8x1x8x8xbf16>
    tpu.vector_store %arg5[%c0_12, %c0_13, %c1, %c0_14, %c0_15], %19 {strides = array<i32>} : memref<1x8x2x8x8xbf16, #tpu.memory_space<vmem>>, vector<1x8x1x8x8xbf16>,
    return
  }
  func.func @transform_0(%arg0: i32, %arg1: i32) -> (i32, i32, i32, i32) {
    %c0_i32 = arith.constant 0 : i32
    %c0_i32_0 = arith.constant 0 : i32
    %c0_i32_1 = arith.constant 0 : i32
    return %arg0, %arg1, %c0_i32, %c0_i32_0 : i32, i32, i32, i32
  }
  func.func @transform_1(%arg0: i32, %arg1: i32) -> (i32, i32) {
    %c0_i32 = arith.constant 0 : i32
    %c0_i32_0 = arith.constant 0 : i32
    %c0_i32_1 = arith.constant 0 : i32
    return %c0_i32, %c0_i32_0 : i32, i32
  }
  func.func @transform_2(%arg0: i32, %arg1: i32) -> (i32, i32) {
    %c0_i32 = arith.constant 0 : i32
    %c0_i32_0 = arith.constant 0 : i32
    %c0_i32_1 = arith.constant 0 : i32
    return %c0_i32, %c0_i32_0 : i32, i32
  }
  func.func @transform_3(%arg0: i32, %arg1: i32) -> (i32, i32, i32, i32, i32) {
    %c0_i32 = arith.constant 0 : i32
    %c0_i32_0 = arith.constant 0 : i32
    %c0_i32_1 = arith.constant 0 : i32
    %c0_i32_2 = arith.constant 0 : i32
    return %arg0, %arg1, %c0_i32, %c0_i32_0, %c0_i32_1 : i32, i32, i32, i32, i32
  }
}

</mosaic_0001>

<bundles_post_ra>
// kernel: tpu_custom_call.1
= control target key start
LH: loop header
LB: loop body
LE: loop exit
PB: predicated region body
PF: predicated region fallthrough
CT: control target
= control target key end

     0   :  { %s985_s0 = inlined_call_operand.hbm [shape: bf16[2,8,8,8], index: 0, kind: input, shape index: {}]   ;;  %s986_s1 = inlined_call_operand.hbm [shape: bf16[8,16], index: 1, kind: input, shape index: {}]   ;;  %s987_s2 = inlined_call_operand.vmem [shape: f32[1,16], index: 2, kind: input, shape index: {}]   ;;  %s988_s3 = inlined_call_operand.hbm [shape: bf16[2,8,2,8,8], index: 3, kind: output, shape index: {}]  }
   0x1   :  { %989 = sst [smem:[#allocation11_spill]] %s986_s1 }
   0x2   :  { %8 = vsyncpa [#allocation3], 0 }
   0x3   :  { %10 = vsyncpa [#allocation3 + $0x1], 0 }
   0x4   :  { %11 = vsyncpa [#allocation6], 0 }
   0x5   :  { %12 = vsyncpa [#allocation4], 0 }
   0x6   :  { %14 = vsyncpa [#allocation4 + $0x1], 0  ;;  %s787_s12 = smov 0   ;;  %s789_s13 = smov 0  }
   0x7   :  { %s791_s14 = smov 0   ;;  %s793_s15 = smov 0  }
   0x8   :  { %s795_s16 = smov 0   ;;  %s797_s17 = smov 0  }
   0x9 LB: > { %s480_s18 = sadd.s32 4294967295, %s759_s17   ;;  %s481_s19 = sadd.s32 4294967294, %s759_s17   ;;  %s759_s17 = sphi %s797_s17, %s20_s17   ;;  %s755_s16 = sphi %s795_s16, %s1002_s16   ;;  %s751_s15 = sphi %s793_s15, %s1001_s15   ;;  %s747_s14 = sphi %s791_s14, %s1000_s14   ;;  %s743_s13 = sphi %s789_s13, %s999_s13   ;;  %s739_s12 = sphi %s787_s12, %s998_s12  }
   0xa   : > { %s41_s20 = sadd.s32 1, %s747_s14  ;;  %p48_p0 = scmp.ne.s32.totalorder %s747_s14, %s743_s13 }
   0xb   : > { %p49_p1 = scmp.eq.s32.totalorder %s759_s17, 0  ;;  %p54_p2 = scmp.ne.s32.totalorder %s743_s13, %s739_s12 }
   0xc   : > { %p825_p3 = scmp.eq.s32.totalorder %s480_s18, 0  ;;  %p122_p4 = scmp.eq.s32.totalorder %s480_s18, 1 }
   0xd   : > { %p829_p5 = por %p49_p1, %p48_p0  ;;  %p128_p6 = scmp.eq.s32.totalorder %s481_s19, 1 }
   0xe   : > { %p835_p7 = por %p825_p3, %p54_p2  ;;  %p839_p8 = por %p122_p4, %p48_p0 }
   0xf   : > { %p843_p9 = por %p128_p6, %p54_p2  ;;  %p482_p10 = scmp.ge.s32.totalorder %s759_s17, 1 }
  0x10   : > { %p135_p11 = scmp.lt.s32.totalorder %s759_s17, 3  ;;  %s995_s1 = sld [smem:[#allocation11_spill]] }
  0x11   : > { %s761_s30 = smov [#allocation5]   ;;  %p484_p13 = scmp.ge.s32.totalorder %s759_s17, 2 }
  0x12   : > { %p852_p12 = pnand %p482_p10, %p135_p11  ;;  %s149_s4 = sshll.u32 %s761_s30, 4  ;;  %s150_s4 = int_to_ptr.vmem [resolvable:$true] %s149_s4 }
  0x13   : > { %p555_p1 = scmp.lt.s32.totalorder %s759_s17, 2  ;;  %s32_s6 = sadd.s32 1, %s755_s16 }
  0x14   : > { %p542_p0 = pneg %p852_p12  ;;  %p34_p6 = scmp.ge.s32.totalorder %s32_s6, 2 }
  0x15   : > { %p864_p4 = pnand %p555_p1, %p829_p5  ;;  %s163_s7 = sand.u32 1, %s747_s14  }
  0x16   : > { %s147_s28 = sshll.u32 %s995_s1, 4  ;;  %p543_p2 = pnand %p542_p0, %p825_p3  ;;  %s148_s28 = int_to_ptr.hbm [resolvable:$true] %s147_s28 }
  0x17   : > { %s1004_s6 = smov (%p34_p6, %s32_s6), 0  ;;  %s485_s8 = sshll.u32 %s163_s7, 5 }
  0x18   : > { %545 = dma.hbm_to_vmem [thread:$0]  (!%p543_p2), %s148_s28, 64, %s150_s4, [#allocation6]  }
  0x19   : > { %s36_s9 = ssub.s32 %s755_s16, %s1004_s6  ;;  %s525_s10 = sshll.u32 %s755_s16, 5 }
  0x1a   : > { %p39_p10 = scmp.eq.s32.totalorder %s36_s9, 0  ;;  %s174_s19 = scalar_lea.hbm %s985_s0, %s525_s10 }
  0x1b   : > { %s167_s22 = scalar_lea.vmem [#allocation2], %s485_s8  ;;  %s175_s30 = sshll.u32 %s174_s19, 4  ;;  %s176_s30 = int_to_ptr.hbm [resolvable:$true] %s175_s30 }
  0x1c   : > { %s177_s26 = sshll.u32 %s167_s22, 4  ;;  %s164_s28 = scalar_lea.sflag [#allocation3], %s163_s7  ;;  %s178_s26 = int_to_ptr.vmem [resolvable:$true] %s177_s26 }
  0x1d   : > { %s881_s27 = scalar_select %p39_p10, %s747_s14, %s41_s20  }
  0x1e   : > { %s762_s4 = smov 64   ;;  %s763_s1 = smov 4  }
  0x1f   : > { %549 = dma.hbm_to_vmem [thread:$0]  (!%p864_p4), %s176_s30, 512, %s178_s26, %s164_s28, %s762_s4, %s762_s4, %s763_s1  }
  0x20   : > { %189 = sbr.rel (%p852_p12) target bundleno = 311 (0x137), region = 32  ;;  %s888_s9 = sand.u32 (!%p852_p12), 1, %s743_s13  }
  0x21   : > { %s489_s8 = sshll.u32 (!%p852_p12), %s888_s9, 5  ;;  %s192_s20 = scalar_lea.sflag (!%p852_p12), [#allocation3], %s888_s9 }
  0x22   : > { %s195_s10 = scalar_lea.vmem (!%p852_p12), [#allocation2], %s489_s8 }
  0x25   : > { %726 = dma.done.wait (%p835_p7), %s192_s20, 512  }
  0x26   : > { %728 = vsyncadd (%p835_p7), %s192_s20, 4294966784 }
  0x27   : > { %730 = dma.done.wait (%p825_p3), [#allocation6], 64  }
  0x28   : > { %732 = vsyncadd (%p825_p3), [#allocation6], 4294967232  ;;  %vm273_vm0 = vcmask 1043456   ;;  %v235_v0 = vld [vmem:[#allocation5] sm:$0xf]  ;;  %v527_v3 = vld [vmem:[%s195_s10 + $0x8] sm:$0xff] }
  0x29   : > { %v275_v1 = vsel %vm273_vm0, %v235_v0, 0  ;;  %v526_v2 = vld [vmem:[%s195_s10] sm:$0xff]  ;;  %vm260_vm1 = vcmask 64512   ;;  %v529_v4 = vld [vmem:[%s195_s10 + $0x18] sm:$0xff]  ;;  %v528_v5 = vld [vmem:[%s195_s10 + $0x10] sm:$0xff]  ;;  %s491_s23 = sshll.u32 %s888_s9, 6 }
  0x2a   : > { %284 = vmatpush.bf16.msra.mxu0 %v275_v1  ;;  %531 = vmatpush.bf16.msra.mxu1 %v275_v1  ;;  %v612_v6 = vld [vmem:[%s987_s2] ss:$0 sm:$0xff]  ;;  %vm314_vm2 = vcmask 60416   ;;  %s904_s29 = scalar_lea.vmem [#allocation7], %s491_s23  ;;  %s764_s5 = smov 120  }
  0x2b   : > { %533 = vmatpush.bf16.msra.mxu3 %v275_v1  ;;  %532 = vmatpush.bf16.msra.mxu2 %v275_v1  ;;  %s530_s7 = sshll.u32 %s751_s15, 6  ;;  %s380_s22 = sshll.u32 %s904_s29, 4  ;;  %s381_s22 = int_to_ptr.vmem [resolvable:$true] %s380_s22 }
  0x2c   : > { %s379_s19 = scalar_lea.hbm %s988_s3, %s530_s7  ;;  %s365_s15 = scalar_lea.sflag [#allocation4], %s888_s9 }
  0x2d   : > { %508 = vmatmul.msk.bf16.vlgmr.msra.gmra.mxu0 %vm260_vm1, %v526_v2  ;;  %509 = vmatmul.msk.bf16.vlgmr.msra.gmra.mxu1 %vm260_vm1, %v527_v3  ;;  %s382_s26 = sshll.u32 %s379_s19, 4  ;;  %s693_s20 = scalar_lea.hbm %s988_s3, 128  ;;  %s383_s26 = int_to_ptr.hbm [resolvable:$true] %s382_s26 }
  0x2e   : > { %511 = vmatmul.msk.bf16.vlgmr.msra.gmra.mxu3 %vm260_vm1, %v529_v4  ;;  %510 = vmatmul.msk.bf16.vlgmr.msra.gmra.mxu2 %vm260_vm1, %v528_v5  ;;  %s687_s30 = sshra.s32 %s383_s26, 4  ;;  %s688_s30 = int_to_ptr.hbm [resolvable:$true] %s687_s30 }
  0x2f   : > { %s689_s28 = scalar_lea.hbm %s688_s30, 64  ;;  %p694_p11 = scmp.lt.s32.totalorder %s688_s30, %s988_s3 }
  0x30   : > { %p690_p3 = scmp.ne.s32.totalorder %s688_s30, %s689_s28  ;;  %p695_p12 = scmp.lt.s32.totalorder %s693_s20, %s689_s28 }
  0x32   : > { %p691_p5 = pnand %p690_p3, %p839_p8  ;;  %p696_p0 = por %p695_p12, %p694_p11 }
  0x34   : > { %p692_p7 = pneg %p691_p5 }
  0x36   : > { %p697_p1 = pnand %p696_p0, %p692_p7 }
  0xaa   : > { %v286_v7 = vpop.f32.mrf.mxu0  ;;  %v291_v8 = vpop.f32.mrf.mxu1 }
  0xab   : > { %v287_v9 = vadd.f32 %v612_v6, %v286_v7  ;;  %v292_v10 = vadd.f32 %v612_v6, %v291_v8 }
  0xad   : > { %v306_v11 = vpack.c.bf16 %v287_v9, %v287_v9  ;;  %v308_v12 = vpack.c.bf16 %v292_v10, %v292_v10 }
  0xaf   : > { %315 = vst.msk [vmem:[%s904_s29] sm:$0xf] %vm314_vm2, %v306_v11  ;;  %335 = vrot.lane.b32.xlu1 %v308_v12, %s764_s5  ;;  %331 = vrot.lane.b32.xlu0 %v306_v11, %s764_s5 }
  0xb0   : > { %317 = vst.msk [vmem:[%s904_s29 + $0x10] sm:$0xf] %vm314_vm2, %v308_v12 }
  0xb1   : > { %v301_v13 = vpop.f32.mrf.mxu3  ;;  %v296_v14 = vpop.f32.mrf.mxu2 }
  0xb2   : > { %v302_v15 = vadd.f32 %v612_v6, %v301_v13  ;;  %v288_v16 = vpop.f32.mrf.mxu0  ;;  %v293_v17 = vpop.f32.mrf.mxu1  ;;  %v297_v18 = vadd.f32 %v612_v6, %v296_v14 }
  0xb3   : > { %v289_v19 = vadd.f32 %v612_v6, %v288_v16  ;;  %v294_v20 = vadd.f32 %v612_v6, %v293_v17 }
  0xb4   : > { %v312_v21 = vpack.c.bf16 %v302_v15, %v302_v15  ;;  %v310_v22 = vpack.c.bf16 %v297_v18, %v297_v18 }
  0xb5   : > { %v307_v23 = vpack.c.bf16 %v289_v19, %v289_v19  ;;  %v309_v24 = vpack.c.bf16 %v294_v20, %v294_v20 }
  0xb6   : > { %321 = vst.msk [vmem:[%s904_s29 + $0x30] sm:$0xf] %vm314_vm2, %v312_v21  ;;  %339 = vrot.lane.b32.xlu2 %v310_v22, %s764_s5 }
  0xb7   : > { %316 = vst.msk [vmem:[%s904_s29 + $0x8] sm:$0xf] %vm314_vm2, %v307_v23  ;;  %337 = vrot.lane.b32.xlu1 %v309_v24, %s764_s5  ;;  %333 = vrot.lane.b32.xlu0 %v307_v23, %s764_s5 }
  0xb8   : > { %318 = vst.msk [vmem:[%s904_s29 + $0x18] sm:$0xf] %vm314_vm2, %v309_v24 }
  0xb9   : > { %v303_v25 = vpop.f32.mrf.mxu3  ;;  %319 = vst.msk [vmem:[%s904_s29 + $0x20] sm:$0xf] %vm314_vm2, %v310_v22  ;;  %v298_v26 = vpop.f32.mrf.mxu2 }
  0xba   : > { %v304_v27 = vadd.f32 %v612_v6, %v303_v25  ;;  %v299_v28 = vadd.f32 %v612_v6, %v298_v26 }
  0xbc   : > { %v313_v29 = vpack.c.bf16 %v304_v27, %v304_v27  ;;  %v311_v30 = vpack.c.bf16 %v299_v28, %v299_v28 }
  0xbe   : > { %322 = vst.msk [vmem:[%s904_s29 + $0x38] sm:$0xf] %vm314_vm2, %v313_v29  ;;  %341 = vrot.lane.b32.xlu2 %v311_v30, %s764_s5 }
  0xbf   : > { %345 = vrot.lane.b32.xlu1 %v313_v29, %s764_s5  ;;  %343 = vrot.lane.b32.xlu0 %v312_v21, %s764_s5  ;;  %320 = vst.msk [vmem:[%s904_s29 + $0x28] sm:$0xf] %vm314_vm2, %v311_v30 }
 0x110   : > { %v340_v31 = vpop.permute.xlu2 %339 }
 0x111   : > { %516 = vst.msk [vmem:[%s904_s29 + $0x24] sm:$0xf] %vm314_vm2, %v340_v31 }
 0x118   : > { %v342_v32 = vpop.permute.xlu2 %341 }
 0x119   : > { %517 = vst.msk [vmem:[%s904_s29 + $0x2c] sm:$0xf] %vm314_vm2, %v342_v32 }
 0x121   : > { %v336_v33 = vpop.permute.xlu1 %335  ;;  %v332_v34 = vpop.permute.xlu0 %331 }
 0x122   : > { %514 = vst.msk [vmem:[%s904_s29 + $0x14] sm:$0xf] %vm314_vm2, %v336_v33 }
 0x123   : > { %512 = vst.msk [vmem:[%s904_s29 + $0x4] sm:$0xf] %vm314_vm2, %v332_v34 }
 0x129   : > { %v338_v35 = vpop.permute.xlu1 %337  ;;  %v334_v36 = vpop.permute.xlu0 %333 }
 0x12a   : > { %515 = vst.msk [vmem:[%s904_s29 + $0x1c] sm:$0xf] %vm314_vm2, %v338_v35 }
 0x12b   : > { %513 = vst.msk [vmem:[%s904_s29 + $0xc] sm:$0xf] %vm314_vm2, %v334_v36 }
 0x131   : > { %v346_v37 = vpop.permute.xlu1 %345  ;;  %v344_v38 = vpop.permute.xlu0 %343 }
 0x132   : > { %519 = vst.msk [vmem:[%s904_s29 + $0x3c] sm:$0xf] %vm314_vm2, %v346_v37 }
 0x133   : > { %518 = vst.msk [vmem:[%s904_s29 + $0x34] sm:$0xf] %vm314_vm2, %v344_v38 }
 0x134   : > { %700 = shalt.err (!%p697_p1)
}
 0x135   : > { %s765_s9 = smov 64   ;;  %s766_s21 = smov 4  }
 0x136   : > { %540 = dma.vmem_to_hbm [thread:$0]  (%p839_p8), %s381_s22, 1024, %s383_s26, %s365_s15, %s765_s9, %s765_s9, %s766_s21  }
 0x137 PF: > { %s397_s23 = sand.u32 1, %s739_s12   ;;  %p551_p2 = pnand %p484_p13, %p843_p9 }
 0x138   : > { %s398_s29 = scalar_lea.sflag [#allocation4], %s397_s23 }
 0x139   : > { %p552_p4 = pneg %p551_p2 }
 0x13b   : > { %734 = dma.done.wait (%p552_p4), %s398_s29, 1024  }
 0x13c   : > { %736 = vsyncadd (%p552_p4), %s398_s29, 4294966272  ;;  %s20_s17 = sadd.s32 1, %s759_s17   ;;  %s998_s12 = smov %s743_s13 }
 0x13d   : > { %p17_p6 = scmp.ge.s32.totalorder %s20_s17, 4   ;;  %s999_s13 = smov %s747_s14 }
 0x13e   : > { %s1000_s14 = smov %s881_s27  ;;  %s1001_s15 = smov %s755_s16 }
 0x13f   : > { %s1002_s16 = smov %s1004_s6  ;;  %19 = sbr.rel (!%p17_p6) target bundleno = 9 (0x9), region = 82 }
 0x144   :  { %404 = vsyncpa [#allocation3], 1 }
 0x145   :  { %406 = vsyncpa [#allocation3 + $0x1], 1 }
 0x146   :  { %407 = vsyncpa [#allocation6], 1 }
 0x147   :  { %408 = vsyncpa [#allocation4], 1 }
 0x148   :  { %410 = vsyncpa [#allocation4 + $0x1], 1 }

</bundles_post_ra>
